<compile_context>
chip_gen: v6e
topology: v6e:2x2x1
jax: 0.10.0
libtpu: 0.0.40
codegen_flags: <defaults>
</compile_context>

<pallas_src>
import jax
import jax.numpy as jnp
from jax.experimental import pallas as pl
from jax.experimental.pallas import tpu as pltpu


# ----------------------------------------------------------------------------
# Pallas kernel: one (batch, pixel-tile) block of the conditional 1x1 conv.
#   x_ref : (Cin,  tile)    f32  activations, pixels on the lane dim
#   w_ref : (Cout, Cin)     f32  1x1 conv weight (torch layout, 1x1 squeezed)
#   b_ref : (Cout, 1)       f32  bias
#   et_ref: (Cout, n_steps) f32  transposed embedding table (VMEM resident)
#   t_ref : (1, tile)       i32  per-pixel timestep indices
#   o_ref : (Cout, tile)    f32  gamma * (w @ x + b)
# ----------------------------------------------------------------------------
def _cond_conv_kernel(x_ref, w_ref, b_ref, et_ref, t_ref, o_ref):
    n_steps = et_ref.shape[1]
    tile = t_ref.shape[1]

    # 1x1 conv as (Cout, Cin) @ (Cin, tile) on the MXU, f32 accumulation.
    acc = jnp.dot(w_ref[...], x_ref[...], preferred_element_type=jnp.float32)

    # In-kernel embedding gather: one-hot(t) on the VPU, gather via a second
    # (tiny-K) MXU matmul -- both units have huge slack in this mem-bound
    # kernel, and this replaces a Cout*4 B/pixel HBM stream with 4 B/pixel.
    steps = jax.lax.broadcasted_iota(jnp.int32, (n_steps, tile), 0)
    onehot = (steps == t_ref[...]).astype(jnp.float32)            # (n_steps, tile)
    gamma = jnp.dot(et_ref[...], onehot,
                    preferred_element_type=jnp.float32)           # (Cout, tile)

    o_ref[...] = gamma * (acc + b_ref[...])


# ----------------------------------------------------------------------------
# Wrapper: free reshapes only (no transposes, no activation casts), then
# pallas_call with a lane-dense pixel tile.
# ----------------------------------------------------------------------------
def conditional_conv2d_forward(x, t, weight, bias, embed, *, row_tile=512):
    """ConditionalConv2d.forward.

    x:      (B, Cin, H, W)   f32  NCHW input
    t:      (B, H*W)         i32  per-pixel timestep indices
    weight: (Cout, Cin)      f32  1x1 conv weight (torch layout, 1x1 squeezed)
    bias:   (Cout,)          f32
    embed:  (n_steps, Cout)  f32  nn.Embedding weight
    """
    B, Cin, H, W = x.shape
    Cout = weight.shape[0]
    n_steps = embed.shape[0]
    HW = H * W

    # Lane-dense pixel tile (multiple of 128), clamped to the (padded) row.
    tile = min(row_tile, pl.cdiv(HW, 128) * 128)
    tile = max(128, (tile // 128) * 128)
    hw_pad = pl.cdiv(HW, tile) * tile

    # Free reshapes -- pixels stay in NCHW order, channels on the sublane dim.
    x_r = x.reshape(B, Cin, HW).astype(jnp.float32)
    t_r = t.reshape(B, 1, HW).astype(jnp.int32)
    if hw_pad != HW:
        x_r = jnp.pad(x_r, ((0, 0), (0, 0), (0, hw_pad - HW)))
        t_r = jnp.pad(t_r, ((0, 0), (0, 0), (0, hw_pad - HW)))

    w_r = weight.astype(jnp.float32)                               # (Cout, Cin)
    b_r = bias.reshape(Cout, 1).astype(jnp.float32)                # (Cout, 1)
    embed_t = embed.T.astype(jnp.float32)                          # (Cout, n_steps)

    grid = (B, hw_pad // tile)

    cost = pl.CostEstimate(
        flops=2 * B * hw_pad * Cout * (Cin + n_steps),
        transcendentals=0,
        bytes_accessed=4 * (x_r.size + t_r.size + B * Cout * hw_pad
                            + w_r.size + b_r.size + embed_t.size),
    )

    out = pl.pallas_call(
        _cond_conv_kernel,
        out_shape=jax.ShapeDtypeStruct((B, Cout, hw_pad), jnp.float32),
        grid=grid,
        in_specs=[
            pl.BlockSpec((None, Cin, tile), lambda b, j: (b, 0, j)),   # x
            pl.BlockSpec((Cout, Cin), lambda b, j: (0, 0)),            # weight
            pl.BlockSpec((Cout, 1), lambda b, j: (0, 0)),              # bias
            pl.BlockSpec((Cout, n_steps), lambda b, j: (0, 0)),        # embed^T
            pl.BlockSpec((None, 1, tile), lambda b, j: (b, 0, j)),     # t
        ],
        out_specs=pl.BlockSpec((None, Cout, tile), lambda b, j: (b, 0, j)),
        compiler_params=pltpu.CompilerParams(
            dimension_semantics=("parallel", "parallel")),
        cost_estimate=cost,
    )(x_r, w_r, b_r, embed_t, t_r)

    return out[:, :, :HW].reshape(B, Cout, H, W)                   # still NCHW


# ----------------------------------------------------------------------------
# Pure-JAX f32 reference mirroring the PyTorch module (for sanity checking).
# ----------------------------------------------------------------------------
def _reference_forward(x, t, weight, bias, embed):
    B, Cin, H, W = x.shape
    Cout = weight.shape[0]
    out = jnp.einsum("oc,bchw->bohw", weight, x) + bias.reshape(1, -1, 1, 1)
    gamma = embed[t]                                               # (B, H*W, Cout)
    gamma = gamma.transpose(0, 2, 1).reshape(B, Cout, H, W)
    return gamma * out


if __name__ == "__main__":
    B, Cin, Cout, n_steps, H, W = 2, 16, 32, 16, 16, 16

    key = jax.random.PRNGKey(0)
    k_w, k_b, k_e, k_x, k_t = jax.random.split(key, 5)

    weight = (jax.random.normal(k_w, (Cout, Cin)) / jnp.sqrt(Cin)).astype(jnp.float32)
    bias = (0.1 * jax.random.normal(k_b, (Cout,))).astype(jnp.float32)
    embed = jax.random.uniform(k_e, (n_steps, Cout), jnp.float32)  # .uniform_() init
    x = jax.random.normal(k_x, (B, Cin, H, W), jnp.float32)
    t = jax.random.randint(k_t, (B, H * W), 0, n_steps, jnp.int32)

    out = conditional_conv2d_forward(x, t, weight, bias, embed)
    out = jax.block_until_ready(out)
    assert out.shape == (B, Cout, H, W), out.shape

    ref = _reference_forward(x, t, weight, bias, embed)
    max_err = float(jnp.max(jnp.abs(out - ref)))
    # f32 MXU matmul vs XLA f32 einsum -> tiny, bounded mismatch.
    assert jnp.allclose(out, ref, rtol=2e-2, atol=2e-2), max_err

    print("KERNEL_OK")
</pallas_src>

<mosaic_0001>
module attributes {stable_mosaic.version = 11 : i64} {
  func.func @_cond_conv_kernel(%arg0: i32, %arg1: i32, %arg2: memref<1x16x256xf32, #tpu.memory_space<vmem>>, %arg3: memref<32x16xf32, #tpu.memory_space<vmem>>, %arg4: memref<32x1xf32, #tpu.memory_space<vmem>>, %arg5: memref<32x16xf32, #tpu.memory_space<vmem>>, %arg6: memref<1x1x256xi32, #tpu.memory_space<vmem>>, %arg7: memref<1x32x256xf32, #tpu.memory_space<vmem>>) attributes {dimension_semantics = [#tpu.dimension_semantics<parallel>, #tpu.dimension_semantics<parallel>], iteration_bounds = array<i64: 2, 1>, scalar_prefetch = 0 : i64, scratch_operands = 0 : i64, tpu.core_type = #tpu.core_type<tc>, window_params = [{transform_indices = @transform_0, window_bounds = array<i64: 1, 16, 256>}, {pipeline_mode = #tpu.pipeline_mode<synchronous>, transform_indices = @transform_1, window_bounds = array<i64: 32, 16>}, {pipeline_mode = #tpu.pipeline_mode<synchronous>, transform_indices = @transform_2, window_bounds = array<i64: 32, 1>}, {pipeline_mode = #tpu.pipeline_mode<synchronous>, transform_indices = @transform_3, window_bounds = array<i64: 32, 16>}, {transform_indices = @transform_4, window_bounds = array<i64: 1, 1, 256>}, {transform_indices = @transform_5, window_bounds = array<i64: 1, 32, 256>}]} {
    %c0 = arith.constant 0 : index
    %c0_0 = arith.constant 0 : index
    %0 = vector.load %arg3[%c0, %c0_0] : memref<32x16xf32, #tpu.memory_space<vmem>>, vector<32x16xf32>
    %c0_1 = arith.constant 0 : index
    %c0_2 = arith.constant 0 : index
    %c0_3 = arith.constant 0 : index
    %1 = vector.load %arg2[%c0_1, %c0_2, %c0_3] : memref<1x16x256xf32, #tpu.memory_space<vmem>>, vector<1x16x256xf32>
    %2 = vector.shape_cast %1 : vector<1x16x256xf32> to vector<16x256xf32>
    %cst = arith.constant dense<0.000000e+00> : vector<32x256xf32>
    %3 = tpu.matmul %0, %2, %cst {dimension_numbers = #tpu.dot_dimension_numbers<[1], [0], [0], [1], [0, 0, 1, 1], [], []>} : vector<32x16xf32>, vector<16x256xf32>, vector<32x256xf32> -> vector<32x256xf32>
    %4 = tpu.iota {dimensions = array<i32: 0>} : vector<16x256xi32>
    %c0_4 = arith.constant 0 : index
    %c0_5 = arith.constant 0 : index
    %c0_6 = arith.constant 0 : index
    %5 = vector.load %arg6[%c0_4, %c0_5, %c0_6] : memref<1x1x256xi32, #tpu.memory_space<vmem>>, vector<1x1x256xi32>
    %6 = vector.shape_cast %5 : vector<1x1x256xi32> to vector<1x256xi32>
    %7 = vector.broadcast %6 : vector<1x256xi32> to vector<16x256xi32>
    %8 = arith.cmpi eq, %4, %7 : vector<16x256xi32>
    %9 = arith.extui %8 : vector<16x256xi1> to vector<16x256xi32>
    %10 = arith.sitofp %9 : vector<16x256xi32> to vector<16x256xf32>
    %c0_7 = arith.constant 0 : index
    %c0_8 = arith.constant 0 : index
    %11 = vector.load %arg5[%c0_7, %c0_8] : memref<32x16xf32, #tpu.memory_space<vmem>>, vector<32x16xf32>
    %cst_9 = arith.constant dense<0.000000e+00> : vector<32x256xf32>
    %12 = tpu.matmul %11, %10, %cst_9 {dimension_numbers = #tpu.dot_dimension_numbers<[1], [0], [0], [1], [0, 0, 1, 1], [], []>} : vector<32x16xf32>, vector<16x256xf32>, vector<32x256xf32> -> vector<32x256xf32>
    %c0_10 = arith.constant 0 : index
    %c0_11 = arith.constant 0 : index
    %13 = vector.load %arg4[%c0_10, %c0_11] : memref<32x1xf32, #tpu.memory_space<vmem>>, vector<32x1xf32>
    %14 = vector.broadcast %13 : vector<32x1xf32> to vector<32x256xf32>
    %15 = arith.addf %3, %14 : vector<32x256xf32>
    %16 = arith.mulf %12, %15 : vector<32x256xf32>
    %c0_12 = arith.constant 0 : index
    %c0_13 = arith.constant 0 : index
    %c0_14 = arith.constant 0 : index
    %17 = vector.load %arg7[%c0_12, %c0_13, %c0_14] : memref<1x32x256xf32, #tpu.memory_space<vmem>>, vector<1x32x256xf32>
    %18 = vector.shape_cast %17 : vector<1x32x256xf32> to vector<32x256xf32>
    %19 = vector.shape_cast %16 : vector<32x256xf32> to vector<1x32x256xf32>
    tpu.vector_store %arg7[%c0_12, %c0_13, %c0_14], %19 {strides = array<i32>} : memref<1x32x256xf32, #tpu.memory_space<vmem>>, vector<1x32x256xf32>,
    return
  }
  func.func @transform_0(%arg0: i32, %arg1: i32) -> (i32, i32, i32) {
    %c0_i32 = arith.constant 0 : i32
    %c0_i32_0 = arith.constant 0 : i32
    return %arg0, %c0_i32, %arg1 : i32, i32, i32
  }
  func.func @transform_1(%arg0: i32, %arg1: i32) -> (i32, i32) {
    %c0_i32 = arith.constant 0 : i32
    %c0_i32_0 = arith.constant 0 : i32
    %c0_i32_1 = arith.constant 0 : i32
    return %c0_i32, %c0_i32_0 : i32, i32
  }
  func.func @transform_2(%arg0: i32, %arg1: i32) -> (i32, i32) {
    %c0_i32 = arith.constant 0 : i32
    %c0_i32_0 = arith.constant 0 : i32
    %c0_i32_1 = arith.constant 0 : i32
    return %c0_i32, %c0_i32_0 : i32, i32
  }
  func.func @transform_3(%arg0: i32, %arg1: i32) -> (i32, i32) {
    %c0_i32 = arith.constant 0 : i32
    %c0_i32_0 = arith.constant 0 : i32
    %c0_i32_1 = arith.constant 0 : i32
    return %c0_i32, %c0_i32_0 : i32, i32
  }
  func.func @transform_4(%arg0: i32, %arg1: i32) -> (i32, i32, i32) {
    %c0_i32 = arith.constant 0 : i32
    %c0_i32_0 = arith.constant 0 : i32
    return %arg0, %c0_i32, %arg1 : i32, i32, i32
  }
  func.func @transform_5(%arg0: i32, %arg1: i32) -> (i32, i32, i32) {
    %c0_i32 = arith.constant 0 : i32
    %c0_i32_0 = arith.constant 0 : i32
    return %arg0, %c0_i32, %arg1 : i32, i32, i32
  }
}

</mosaic_0001>

<bundles_post_ra>
// kernel: tpu_custom_call.1
= control target key start
LH: loop header
LB: loop body
LE: loop exit
PB: predicated region body
PF: predicated region fallthrough
CT: control target
= control target key end

     0   :  { %10 = vsyncpa [#allocation3], 0  ;;  %s1068_s0 = inlined_call_operand.vmem [shape: f32[2,16,256], index: 0, kind: input, shape index: {}]   ;;  %s1069_s1 = inlined_call_operand.vmem [shape: f32[32,16], index: 1, kind: input, shape index: {}]   ;;  %s1070_s2 = inlined_call_operand.vmem [shape: f32[32,1], index: 2, kind: input, shape index: {}]   ;;  %s1071_s3 = inlined_call_operand.vmem [shape: f32[32,16], index: 3, kind: input, shape index: {}]   ;;  %s1072_s4 = inlined_call_operand.vmem [shape: s32[2,1,256], index: 4, kind: input, shape index: {}]   ;;  %s1073_s5 = inlined_call_operand.hbm [shape: f32[2,32,256], index: 5, kind: output, shape index: {}]  }
   0x1   :  { %12 = vsyncpa [#allocation3 + $0x1], 0  ;;  %s884_s18 = smov 0   ;;  %s886_s19 = smov 0  }
   0x2   :  { %s888_s20 = smov 0   ;;  %s890_s21 = smov 0  }
   0x3   :  { %s892_s22 = smov 0   ;;  %s894_s23 = smov 0  }
   0x4 LB: > { %s676_s24 = sadd.s32 4294967295, %s846_s23   ;;  %s677_s25 = sadd.s32 4294967294, %s846_s23   ;;  %s846_s23 = sphi %s894_s23, %s18_s23   ;;  %s842_s22 = sphi %s892_s22, %s1080_s22   ;;  %s838_s21 = sphi %s890_s21, %s1079_s21   ;;  %s834_s20 = sphi %s888_s20, %s1078_s20   ;;  %s830_s19 = sphi %s886_s19, %s1077_s19   ;;  %s826_s18 = sphi %s884_s18, %s1076_s18  }
   0x5   : > { %s30_s26 = sadd.s32 1, %s842_s22  ;;  %s158_s27 = sadd.s32 1, %s834_s20 }
   0x6   : > { %p32_p0 = scmp.ge.s32.totalorder %s30_s26, 2  ;;  %p168_p1 = scmp.ne.s32.totalorder %s834_s20, %s830_s19 }
   0x7   : > { %p169_p2 = scmp.eq.s32.totalorder %s676_s24, 1  ;;  %p174_p3 = scmp.ne.s32.totalorder %s830_s19, %s826_s18 }
   0x8   : > { %s1082_s26 = smov (%p32_p0, %s30_s26), 0  ;;  %p175_p5 = scmp.eq.s32.totalorder %s677_s25, 1 }
   0x9   : > { %p924_p4 = por %p169_p2, %p168_p1  ;;  %s153_s29 = ssub.s32 %s842_s22, %s1082_s26 }
   0xa   : > { %p680_p6 = scmp.ge.s32.totalorder %s846_s23, 1  ;;  %p156_p7 = scmp.eq.s32.totalorder %s153_s29, 0 }
   0xb   : > { %p931_p8 = por %p175_p5, %p174_p3  ;;  %p227_p9 = scmp.lt.s32.totalorder %s846_s23, 3 }
   0xc   : > { %s937_s6 = scalar_select %p156_p7, %s834_s20, %s158_s27  }
   0xd   : > { %p228_p10 = pnand %p680_p6, %p227_p9 }
   0xe   : > { %p268_p11 = scmp.lt.s32.totalorder (!%p228_p10), %s838_s21, 1  ;;  %s264_s10 = sand.u32 (!%p228_p10), 1, %s830_s19  }
   0xf   : > { %231 = sbr.rel (%p228_p10) target bundleno = 256 (0x100), region = 40  ;;  %s681_s11 = sshll.u32 (!%p228_p10), %s264_s10, 6 }
  0x14   : > { %v295_v0 = vlaneseq  ;;  %v848_v1 = vmov 0.0   ;;  %s269_s7 = scalar_select %p268_p11, %s838_s21, 1  ;;  %v849_v3 = vmov 0   ;;  %v425_v4 = vld [vmem:[%s1070_s2] sm:$0xff]  ;;  %v427_v5 = vld [vmem:[%s1070_s2 + $0x10] sm:$0xff]  ;;  %v426_v8 = vld [vmem:[%s1070_s2 + $0x8] sm:$0xff] }
  0x15   : > { %525 = vmatprep.mubr.f32.mxu1 %v848_v1  ;;  %400 = vmatprep.mubr.f32.mxu0 %v848_v1  ;;  %v428_v9 = vld [vmem:[%s1070_s2 + $0x18] sm:$0xff]  ;;  %v287_v18 = vld [vmem:[%s1069_s1] sm:$0xff]  ;;  %vm323_vm0 = vcmask 130048   ;;  %v850_v19 = vmov 1.0   ;;  %v288_v21 = vld [vmem:[%s1069_s1 + $0x8] sm:$0xff] }
  0x16   : > { %v296_v2 = vshrl.u32 %v295_v0, 7  ;;  %768 = vset.pattern.permute.xlu0 %v849_v3  ;;  %769 = vset.pattern.permute.xlu1 %v849_v3  ;;  %s706_s12 = sshll.u32 %s269_s7, 5  ;;  %s684_s13 = sshll.u32 %s269_s7, 1  ;;  %v319_v20 = vld [vmem:[%s1071_s3] sm:$0xff]  ;;  %v320_v22 = vld [vmem:[%s1071_s3 + $0x8] sm:$0xff]  ;;  %v289_v23 = vld [vmem:[%s1069_s1 + $0x10] sm:$0xff] }
  0x17   : > { %431 = vperm.xlu0 %768, %v425_v4   ;;  %441 = vperm.xlu1 %769, %v427_v5   ;;  %s275_s16 = scalar_lea.vmem %s1068_s0, %s706_s12  ;;  %s284_s25 = scalar_lea.vmem %s1072_s4, %s684_s13  ;;  %v321_v24 = vld [vmem:[%s1071_s3 + $0x10] sm:$0xff]  ;;  %v290_v25 = vld [vmem:[%s1069_s1 + $0x18] sm:$0xff] }
  0x18   : > { %v305_v6 = vsub.s32 1, %v296_v2  ;;  %v301_v7 = vsub.s32 0, %v296_v2  ;;  %v294_v10 = vld [vmem:[%s275_s16 + $0x18] sm:$0xff]  ;;  %v293_v11 = vld [vmem:[%s275_s16 + $0x10] sm:$0xff]  ;;  %v292_v12 = vld [vmem:[%s275_s16 + $0x8] sm:$0xff]  ;;  %v297_v13 = vadd.s32 8, %v296_v2 }
  0x19   : > { %489 = vmatprep.subr.mxu1 %v294_v10  ;;  %v298_v14 = vld [vmem:[%s284_s25] sm:$0x3]  ;;  %v322_v26 = vld [vmem:[%s1071_s3 + $0x18] sm:$0xff]  ;;  %s1002_s12 = scalar_lea.vmem [#allocation2], %s681_s11  ;;  %s707_s13 = sshll.u32 %s838_s21, 10 }
  0x1a   : > { %v291_v15 = vld [vmem:[%s275_s16] sm:$0xff]  ;;  %490 = vmatpush1.msra.mxu1 %v293_v11  ;;  %v306_v16 = vrot.slane %v298_v14, %v305_v6  ;;  %v302_v17 = vrot.slane %v298_v14, %v301_v7  ;;  %s582_s14 = sshll.u32 %s1002_s12, 4  ;;  %s1015_s17 = scalar_lea.hbm %s1073_s5, %s707_s13  ;;  %s1017_s14 = int_to_ptr.vmem [resolvable:$true] %s582_s14 }
  0x1b   : > { %436 = vperm.xlu0 %768, %v426_v8   ;;  %491 = vmatprep.subr.mxu1 %v292_v12  ;;  %s1023_s21 = scalar_lea.sflag [#allocation3], %s264_s10  ;;  %s770_s24 = scalar_lea.vmem %s1017_s14, 1024 }
  0x1c   : > { %446 = vperm.xlu1 %769, %v428_v9   ;;  %vm310_vm1 = vcmp.eq.s32.totalorder %v297_v13, %v306_v16  ;;  %492 = vmatpush1.msra.mxu1 %v291_v15  ;;  %vm309_vm2 = vcmp.eq.s32.totalorder %v297_v13, %v302_v17  ;;  %vm308_vm3 = vcmp.eq.s32.totalorder %v296_v2, %v306_v16  ;;  %p771_p12 = scmp.ne.s32.totalorder %s1017_s14, %s770_s24  ;;  %s851_s25 = smov [#allocation2]  }
  0x1d   : > { %689 = vmatprep.subr.msk.mxu0 %vm310_vm1, %v850_v19  ;;  %697 = vmatmul.mubr.msk.f32.vlgmr.msra.gmra.mxu1 %vm323_vm0, %v287_v18  ;;  %vm307_vm4 = vcmp.eq.s32.totalorder %v296_v2, %v302_v17  ;;  %s774_s27 = sshll.u32 %s851_s25, 4  ;;  %s775_s27 = int_to_ptr.vmem [resolvable:$false] %s774_s27 }
  0x1e   : > { %690 = vmatpush1.msk.msra.mxu0 %vm309_vm2, %v850_v19  ;;  %531 = vmatprep.mubr.f32.mxu1 %v848_v1  ;;  %p772_p13 = pnand %p771_p12, %p924_p4  ;;  %s776_s29 = scalar_lea.vmem %s775_s27, 2048 }
  0x1f   : > { %691 = vmatprep.subr.msk.mxu0 %vm308_vm3, %v850_v19  ;;  %p777_p1 = scmp.lt.s32.totalorder %s1017_s14, %s775_s27  ;;  %p778_p2 = scmp.lt.s32.totalorder %s776_s29, %s770_s24 }
  0x20   : > { %692 = vmatpush1.msk.msra.mxu0 %vm307_vm4, %v850_v19  ;;  %p773_p0 = pneg %p772_p13 }
  0x21   : > { %693 = vmatmul.mubr.msk.f32.vlgmr.msra.gmra.mxu0 %vm323_vm0, %v319_v20  ;;  %698 = vmatmul.mubr.msk.f32.gmra.mxu1 %vm323_vm0, %v288_v21  ;;  %p779_p3 = por %p778_p2, %p777_p1 }
  0x22   : > { %406 = vmatprep.mubr.f32.mxu0 %v848_v1  ;;  %537 = vmatprep.mubr.f32.mxu1 %v848_v1 }
  0x23   : > { %p780_p5 = pnand %p779_p3, %p773_p0 }
  0x25   : > { %694 = vmatmul.mubr.msk.f32.gmra.mxu0 %vm323_vm0, %v320_v22  ;;  %699 = vmatmul.mubr.msk.f32.gmra.mxu1 %vm323_vm0, %v289_v23 }
  0x26   : > { %412 = vmatprep.mubr.f32.mxu0 %v848_v1  ;;  %543 = vmatprep.mubr.f32.mxu1 %v848_v1 }
  0x29   : > { %695 = vmatmul.mubr.msk.f32.gmra.mxu0 %vm323_vm0, %v321_v24  ;;  %700 = vmatmul.mubr.msk.f32.gmra.mxu1 %vm323_vm0, %v290_v25 }
  0x2a   : > { %418 = vmatprep.mubr.f32.mxu0 %v848_v1 }
  0x2d   : > { %696 = vmatmul.mubr.msk.f32.gmra.mxu0 %vm323_vm0, %v322_v26 }
  0x92   : > { %v432_v27 = vpop.permute.xlu0 %431  ;;  %v442_v33 = vpop.permute.xlu1 %441 }
  0x96   : > { %v437_v31 = vpop.permute.xlu0 %436 }
  0x97   : > { %v447_v46 = vpop.permute.xlu1 %446 }
  0xdd   : > { %v527_v28 = vpop.f32.mrf.mxu1 }
  0xde   : > { %v528_v29 = vadd.f32 %v527_v28, %v432_v27 }
  0xdf   : > { %v529_v30 = vpop.f32.mrf.mxu1 }
  0xe0   : > { %v530_v32 = vadd.f32 %v529_v30, %v432_v27 }
  0xe1   : > { %v402_v34 = vpop.f32.mrf.mxu0  ;;  %v533_v35 = vpop.f32.mrf.mxu1 }
  0xe2   : > { %v550_v36 = vmul.f32 %v528_v29, %v402_v34  ;;  %v534_v37 = vadd.f32 %v533_v35, %v437_v31 }
  0xe3   : > { %v404_v38 = vpop.f32.mrf.mxu0  ;;  %v535_v39 = vpop.f32.mrf.mxu1 }
  0xe4   : > { %558 = vst [vmem:[%s1002_s12] sm:$0xff] %v550_v36  ;;  %v551_v40 = vmul.f32 %v530_v32, %v404_v38  ;;  %v536_v41 = vadd.f32 %v535_v39, %v437_v31 }
  0xe5   : > { %v408_v42 = vpop.f32.mrf.mxu0  ;;  %v539_v43 = vpop.f32.mrf.mxu1 }
  0xe6   : > { %559 = vst [vmem:[%s1002_s12 + $0x8] sm:$0xff] %v551_v40  ;;  %v552_v44 = vmul.f32 %v534_v37, %v408_v42  ;;  %v540_v45 = vadd.f32 %v539_v43, %v442_v33 }
  0xe7   : > { %v410_v47 = vpop.f32.mrf.mxu0  ;;  %v541_v48 = vpop.f32.mrf.mxu1 }
  0xe8   : > { %560 = vst [vmem:[%s1002_s12 + $0x10] sm:$0xff] %v552_v44  ;;  %v553_v49 = vmul.f32 %v536_v41, %v410_v47  ;;  %v542_v50 = vadd.f32 %v541_v48, %v442_v33 }
  0xe9   : > { %v414_v51 = vpop.f32.mrf.mxu0  ;;  %v545_v52 = vpop.f32.mrf.mxu1 }
  0xea   : > { %561 = vst [vmem:[%s1002_s12 + $0x18] sm:$0xff] %v553_v49  ;;  %v554_v53 = vmul.f32 %v540_v45, %v414_v51  ;;  %v546_v54 = vadd.f32 %v545_v52, %v447_v46 }
  0xeb   : > { %v416_v55 = vpop.f32.mrf.mxu0  ;;  %v547_v56 = vpop.f32.mrf.mxu1 }
  0xec   : > { %562 = vst [vmem:[%s1002_s12 + $0x20] sm:$0xff] %v554_v53  ;;  %v555_v57 = vmul.f32 %v542_v50, %v416_v55  ;;  %v548_v58 = vadd.f32 %v547_v56, %v447_v46 }
  0xed   : > { %v420_v59 = vpop.f32.mrf.mxu0 }
  0xee   : > { %563 = vst [vmem:[%s1002_s12 + $0x28] sm:$0xff] %v555_v57  ;;  %v556_v60 = vmul.f32 %v546_v54, %v420_v59 }
  0xef   : > { %v422_v61 = vpop.f32.mrf.mxu0 }
  0xf0   : > { %564 = vst [vmem:[%s1002_s12 + $0x30] sm:$0xff] %v556_v60  ;;  %v557_v62 = vmul.f32 %v548_v58, %v422_v61 }
  0xf2   : > { %565 = vst [vmem:[%s1002_s12 + $0x38] sm:$0xff] %v557_v62 }
  0xf3   : > { %783 = shalt.err (!%p780_p5)
}
  0xf4   : > { %s784_s8 = scalar_lea.hbm %s1015_s17, 1024  ;;  %s788_s10 = scalar_lea.hbm %s1073_s5, 2048 }
  0xf5   : > { %p785_p6 = scmp.ne.s32.totalorder %s1015_s17, %s784_s8  ;;  %p789_p10 = scmp.lt.s32.totalorder %s1015_s17, %s1073_s5 }
  0xf6   : > { %p790_p11 = scmp.lt.s32.totalorder %s788_s10, %s784_s8 }
  0xf7   : > { %p786_p7 = pnand %p785_p6, %p924_p4 }
  0xf8   : > { %p791_p12 = por %p790_p11, %p789_p10 }
  0xf9   : > { %p787_p9 = pneg %p786_p7 }
  0xfb   : > { %p792_p13 = pnand %p791_p12, %p787_p9 }
  0xfd   : > { %795 = shalt.err (!%p792_p13)
}
  0xfe   : > { %s852_s13 = smov 256   ;;  %s853_s15 = smov 16  }
  0xff   : > { %708 = dma.vmem_to_hbm [thread:$0]  (%p924_p4), %s1017_s14, 1024, %s1015_s17, %s1023_s21, %s852_s13, %s852_s13, %s853_s15  }
 0x100 PF: > { %p714_p0 = scmp.ge.s32.totalorder %s846_s23, 2  ;;  %s597_s16 = sand.u32 1, %s826_s18  }
 0x101   : > { %s598_s24 = scalar_lea.sflag [#allocation3], %s597_s16 }
 0x102   : > { %p711_p1 = pnand %p714_p0, %p931_p8 }
 0x104   : > { %p712_p2 = pneg %p711_p1 }
 0x106   : > { %821 = dma.done.wait (%p712_p2), %s598_s24, 1024  }
 0x107   : > { %823 = vsyncadd (%p712_p2), %s598_s24, 4294966272  ;;  %s18_s23 = sadd.s32 1, %s846_s23   ;;  %s1076_s18 = smov %s830_s19 }
 0x108   : > { %p15_p3 = scmp.ge.s32.totalorder %s18_s23, 4   ;;  %s1077_s19 = smov %s834_s20 }
 0x109   : > { %s1078_s20 = smov %s937_s6  ;;  %s1079_s21 = smov %s842_s22 }
 0x10a   : > { %s1080_s22 = smov %s1082_s26  ;;  %17 = sbr.rel (!%p15_p3) target bundleno = 4 (0x4), region = 78 }
 0x10f   :  { %603 = vsyncpa [#allocation3], 1 }
 0x110   :  { %605 = vsyncpa [#allocation3 + $0x1], 1 }

</bundles_post_ra>
